<compile_context>
chip_gen: v7x
topology: tpu7x:2x2x1
jax: 0.10.0
libtpu: 0.0.40
codegen_flags: <defaults>
</compile_context>

<pallas_src>
import jax
import jax.numpy as jnp
from jax.experimental import pallas as pl
from jax.experimental.pallas import tpu as pltpu

# ---- model hyperparameters implied by the module ----
HIDDEN = 32                   # fc_layer_size
N_EMB = 5                     # car_num, queue_length, occupancy, flow, phase
FEAT = N_EMB * HIDDEN         # 160 = in_features of ModelBody.output
N_PHASE = 4
ACTION_SIZE = 4               # must equal 4 for ActorModel.model to typecheck
BATCH = 2

# ---- row offsets inside the packed parameter slabs (8-sublane aligned) ----
ROW_W_EMB, ROW_B_EMB, WIDE_ROWS = 0, 8, 16            # "wide" slab, width FEAT
ROW_W_OUT, ROW_B_OUT = 0, 160                          # "narrow" slab, width 4
ROW_B_CONV, ROW_W1, ROW_B1, ROW_W2, ROW_B2 = 168, 176, 184, 192, 200
NARROW_ROWS = 208


def gesa_kernel(scal_ref, wide_ref, narrow_ref, conv_ref, out_ref):
    """scal: (B*4, 8) per-phase scalars (cols 5..7 zero-padded);
    wide: (16, 160) block-diag embedding weights + bias row;
    narrow: (208, 4) body-output / conv-bias / actor MLP weights;
    conv: (B, 4B) block-diag channel-summed 1x1-conv weights."""
    # ---- five Linear(1,32)+Sigmoid embeddings fused into one matmul ----
    scal = scal_ref[...]                                  # (N, 8), N = B*4
    w_emb = wide_ref[ROW_W_EMB:ROW_W_EMB + 8, :]          # (8, 160) block-diag
    b_emb = wide_ref[ROW_B_EMB:ROW_B_EMB + 1, :]          # (1, 160)
    emb = jax.nn.sigmoid(
        jnp.dot(scal, w_emb, preferred_element_type=jnp.float32) + b_emb)

    # ---- ModelBody.output: Linear(160, 4) per phase ----
    w_out = narrow_ref[ROW_W_OUT:ROW_W_OUT + FEAT, :]     # (160, 4)
    b_out = narrow_ref[ROW_B_OUT:ROW_B_OUT + 1, :]        # (1, 4)
    hs = jnp.dot(emb, w_out, preferred_element_type=jnp.float32) + b_out  # (N,4)

    # ---- ActorModel.pre (1x1 conv) + .sum(1): exact folded contraction ----
    b_conv = narrow_ref[ROW_B_CONV:ROW_B_CONV + 1, :]     # (1, 4)  (= sum of conv biases)
    h = jnp.dot(conv_ref[...], hs,
                preferred_element_type=jnp.float32) + b_conv            # (B, 4)

    # ---- ActorModel.model: Linear(4,4) -> ReLU -> Linear(4,4) ----
    w1 = narrow_ref[ROW_W1:ROW_W1 + 4, :]
    b1 = narrow_ref[ROW_B1:ROW_B1 + 1, :]
    w2 = narrow_ref[ROW_W2:ROW_W2 + 4, :]
    b2 = narrow_ref[ROW_B2:ROW_B2 + 1, :]
    hid = jax.nn.relu(jnp.dot(h, w1, preferred_element_type=jnp.float32) + b1)
    out_ref[...] = jnp.dot(hid, w2, preferred_element_type=jnp.float32) + b2


@jax.jit
def gesa_forward(sa, current_phase, packed):
    B = sa.shape[0]
    sa2 = sa.reshape(B, 16).astype(jnp.float32)
    cp2 = current_phase.reshape(B, N_PHASE).astype(jnp.float32)
    # rows ordered (batch, phase); column k is the k-th scalar feeding the
    # k-th Linear(1,32):  k=0 car_num, 1 queue_length, 2 occupancy, 3 flow,
    # 4 current_phase.  This absorbs the module's row permutation.
    sa_g = sa2.reshape(B, 4, N_PHASE)                     # [b, feature_group, phase]
    scal = jnp.concatenate(
        [jnp.transpose(sa_g, (0, 2, 1)), cp2[..., None]], axis=-1)   # (B, 4, 5)
    scal = scal.reshape(B * N_PHASE, N_EMB)
    scal = jnp.pad(scal, ((0, 0), (0, 8 - N_EMB)))        # pad K to 8 lanes

    args = (scal, packed['wide'], packed['narrow'], packed['conv_block'])
    return pl.pallas_call(
        gesa_kernel,
        out_shape=jax.ShapeDtypeStruct((B, ACTION_SIZE), jnp.float32),
        in_specs=[pl.BlockSpec(memory_space=pltpu.MemorySpace.VMEM)
                  for _ in args],
        out_specs=pl.BlockSpec(memory_space=pltpu.MemorySpace.VMEM),
    )(*args)


def pack_params(p, batch):
    """Pack the 19 PyTorch-layout parameter tensors into 3 VMEM slabs."""
    f32 = jnp.float32
    # wide slab: block-diagonal embedding weights (rows 0..4) + bias row 8
    ws = [p['w_car'], p['w_queue'], p['w_occ'], p['w_flow'], p['w_phase']]
    bs = [p['b_car'], p['b_queue'], p['b_occ'], p['b_flow'], p['b_phase']]
    wide = jnp.zeros((WIDE_ROWS, FEAT), f32)
    for k, w in enumerate(ws):                     # w: (32, 1) PyTorch layout
        wide = wide.at[ROW_W_EMB + k, HIDDEN * k:HIDDEN * (k + 1)].set(w[:, 0])
    wide = wide.at[ROW_B_EMB, :].set(jnp.concatenate(bs))

    # narrow slab (width 4): body output linear, conv bias sum, actor MLP
    narrow = jnp.zeros((NARROW_ROWS, ACTION_SIZE), f32)
    narrow = narrow.at[ROW_W_OUT:ROW_W_OUT + FEAT, :].set(p['w_body_out'].T)
    narrow = narrow.at[ROW_B_OUT, :].set(p['b_body_out'])
    bsum = p['conv_b'].sum()                               # sum over 6 out-chans
    narrow = narrow.at[ROW_B_CONV, :].set(jnp.full((N_PHASE,), bsum, f32))
    narrow = narrow.at[ROW_W1:ROW_W1 + 4, :].set(p['w_a1'].T)
    narrow = narrow.at[ROW_B1, :].set(p['b_a1'])
    narrow = narrow.at[ROW_W2:ROW_W2 + 4, :].set(p['w_a2'].T)
    narrow = narrow.at[ROW_B2, :].set(p['b_a2'])

    # conv block matrix: channel-summed 1x1 conv weights on the block diagonal
    wsum = p['conv_w'][:, :, 0, 0].sum(axis=0)             # (4,)
    conv_block = jnp.kron(jnp.eye(batch, dtype=f32), wsum[None, :])  # (B, 4B)
    return {'wide': wide, 'narrow': narrow, 'conv_block': conv_block}


def init_params(key):
    def lin(k, fan_in, fan_out, scale=0.2):
        kw, kb = jax.random.split(k)
        w = jax.random.normal(kw, (fan_out, fan_in), jnp.float32) * scale  # (out,in)
        b = jax.random.normal(kb, (fan_out,), jnp.float32) * scale
        return w, b

    keys = jax.random.split(key, 9)
    p = {}
    p['w_car'], p['b_car'] = lin(keys[0], 1, HIDDEN)
    p['w_queue'], p['b_queue'] = lin(keys[1], 1, HIDDEN)
    p['w_occ'], p['b_occ'] = lin(keys[2], 1, HIDDEN)
    p['w_flow'], p['b_flow'] = lin(keys[3], 1, HIDDEN)
    p['w_phase'], p['b_phase'] = lin(keys[4], 1, HIDDEN)
    p['w_body_out'], p['b_body_out'] = lin(keys[5], FEAT, N_PHASE)
    kw, kb = jax.random.split(keys[6])
    p['conv_w'] = jax.random.normal(kw, (6, 4, 1, 1), jnp.float32) * 0.2
    p['conv_b'] = jax.random.normal(kb, (6,), jnp.float32) * 0.2
    p['w_a1'], p['b_a1'] = lin(keys[7], ACTION_SIZE, 4)    # Linear(action, hidden=4)
    p['w_a2'], p['b_a2'] = lin(keys[8], 4, ACTION_SIZE)    # Linear(4, action)
    return p


def reference_forward(sa, current_phase, p):
    """Pure-JAX mirror of the PyTorch GESA module."""
    B = sa.shape[0]
    x = sa.reshape(B, 16, 1).astype(jnp.float32)

    def lin(v, w, b):                      # PyTorch Linear: v @ W^T + b
        return v @ w.T + b

    i1 = jax.nn.sigmoid(lin(x[:, 0:4], p['w_car'], p['b_car']))
    i2 = jax.nn.sigmoid(lin(x[:, 4:8], p['w_queue'], p['b_queue']))
    i3 = jax.nn.sigmoid(lin(x[:, 8:12], p['w_occ'], p['b_occ']))
    i4 = jax.nn.sigmoid(lin(x[:, 12:16], p['w_flow'], p['b_flow']))
    cp = current_phase.reshape(B, 4, 1).astype(jnp.float32)
    i5 = jax.nn.sigmoid(lin(cp, p['w_phase'], p['b_phase']))

    inputa = jnp.concatenate([i1, i2, i3, i4], axis=1)                 # (B,16,32)
    perm = jnp.array([0, 4, 8, 12, 1, 5, 9, 13, 2, 6, 10, 14, 3, 7, 11, 15])
    inputa = inputa[:, perm].reshape(B, 4, -1)                         # (B,4,128)
    feat = jnp.concatenate([inputa, i5], axis=2)                       # (B,4,160)
    hidden_states = lin(feat, p['w_body_out'], p['b_body_out'])        # (B,4,4)

    # ActorModel
    hs = hidden_states.reshape(B, hidden_states.shape[-1], -1)         # (B,4,4)
    y = jnp.einsum('oc,bcw->bow', p['conv_w'][:, :, 0, 0], hs) \
        + p['conv_b'][None, :, None]                                   # (B,6,4)
    h = y.sum(axis=1)                                                  # (B,4)
    hid = jax.nn.relu(lin(h, p['w_a1'], p['b_a1']))
    return lin(hid, p['w_a2'], p['b_a2'])


if __name__ == "__main__":
    key = jax.random.PRNGKey(0)
    k_sa, k_cp, k_par = jax.random.split(key, 3)
    sa = jax.random.normal(k_sa, (BATCH, 16, 1), jnp.float32)
    current_phase = jax.random.normal(k_cp, (BATCH, N_PHASE), jnp.float32)
    params = init_params(k_par)
    packed = pack_params(params, BATCH)   # one-time parameter packing

    out = jax.block_until_ready(gesa_forward(sa, current_phase, packed))
    ref = jax.block_until_ready(reference_forward(sa, current_phase, params))

    assert out.shape == (BATCH, ACTION_SIZE), out.shape
    assert jnp.allclose(out, ref, rtol=1e-4, atol=1e-4), (out, ref)
    print("KERNEL_OK")
</pallas_src>

<mosaic_0001>
module attributes {stable_mosaic.version = 11 : i64} {
  func.func @gesa_kernel(%arg0: memref<8x8xf32, #tpu.memory_space<vmem>>, %arg1: memref<16x160xf32, #tpu.memory_space<vmem>>, %arg2: memref<208x4xf32, #tpu.memory_space<vmem>>, %arg3: memref<2x8xf32, #tpu.memory_space<vmem>>, %arg4: memref<2x4xf32, #tpu.memory_space<vmem>>) attributes {dimension_semantics = [], scalar_prefetch = 0 : i64, scratch_operands = 0 : i64, tpu.core_type = #tpu.core_type<tc>} {
    %c0 = arith.constant 0 : index
    %c0_0 = arith.constant 0 : index
    %0 = vector.load %arg0[%c0, %c0_0] : memref<8x8xf32, #tpu.memory_space<vmem>>, vector<8x8xf32>
    %c0_1 = arith.constant 0 : index
    %c0_2 = arith.constant 0 : index
    %1 = vector.load %arg1[%c0_1, %c0_2] : memref<16x160xf32, #tpu.memory_space<vmem>>, vector<8x160xf32>
    %c8 = arith.constant 8 : index
    %c0_3 = arith.constant 0 : index
    %2 = vector.load %arg1[%c8, %c0_3] : memref<16x160xf32, #tpu.memory_space<vmem>>, vector<1x160xf32>
    %cst = arith.constant dense<0.000000e+00> : vector<8x160xf32>
    %3 = tpu.matmul %0, %1, %cst {dimension_numbers = #tpu.dot_dimension_numbers<[1], [0], [0], [1], [0, 0, 1, 1], [], []>} : vector<8x8xf32>, vector<8x160xf32>, vector<8x160xf32> -> vector<8x160xf32>
    %4 = vector.broadcast %2 : vector<1x160xf32> to vector<8x160xf32>
    %5 = arith.addf %3, %4 : vector<8x160xf32>
    %6 = arith.negf %5 : vector<8x160xf32>
    %7 = math.exp %6 : vector<8x160xf32>
    %cst_4 = arith.constant 1.000000e+00 : f32
    %8 = vector.broadcast %cst_4 : f32 to vector<8x160xf32>
    %9 = arith.addf %8, %7 : vector<8x160xf32>
    %10 = arith.divf %8, %9 : vector<8x160xf32>
    %c0_5 = arith.constant 0 : index
    %c0_6 = arith.constant 0 : index
    %11 = vector.load %arg2[%c0_5, %c0_6] : memref<208x4xf32, #tpu.memory_space<vmem>>, vector<160x4xf32>
    %c160 = arith.constant 160 : index
    %c0_7 = arith.constant 0 : index
    %12 = vector.load %arg2[%c160, %c0_7] : memref<208x4xf32, #tpu.memory_space<vmem>>, vector<1x4xf32>
    %cst_8 = arith.constant dense<0.000000e+00> : vector<8x4xf32>
    %13 = tpu.matmul %10, %11, %cst_8 {dimension_numbers = #tpu.dot_dimension_numbers<[1], [0], [0], [1], [0, 0, 1, 1], [], []>} : vector<8x160xf32>, vector<160x4xf32>, vector<8x4xf32> -> vector<8x4xf32>
    %14 = vector.broadcast %12 : vector<1x4xf32> to vector<8x4xf32>
    %15 = arith.addf %13, %14 : vector<8x4xf32>
    %c168 = arith.constant 168 : index
    %c0_9 = arith.constant 0 : index
    %16 = vector.load %arg2[%c168, %c0_9] : memref<208x4xf32, #tpu.memory_space<vmem>>, vector<1x4xf32>
    %c0_10 = arith.constant 0 : index
    %c0_11 = arith.constant 0 : index
    %17 = vector.load %arg3[%c0_10, %c0_11] : memref<2x8xf32, #tpu.memory_space<vmem>>, vector<2x8xf32>
    %cst_12 = arith.constant dense<0.000000e+00> : vector<2x4xf32>
    %18 = tpu.matmul %17, %15, %cst_12 {dimension_numbers = #tpu.dot_dimension_numbers<[1], [0], [0], [1], [0, 0, 1, 1], [], []>} : vector<2x8xf32>, vector<8x4xf32>, vector<2x4xf32> -> vector<2x4xf32>
    %19 = vector.broadcast %16 : vector<1x4xf32> to vector<2x4xf32>
    %20 = arith.addf %18, %19 : vector<2x4xf32>
    %c176 = arith.constant 176 : index
    %c0_13 = arith.constant 0 : index
    %21 = vector.load %arg2[%c176, %c0_13] : memref<208x4xf32, #tpu.memory_space<vmem>>, vector<4x4xf32>
    %c184 = arith.constant 184 : index
    %c0_14 = arith.constant 0 : index
    %22 = vector.load %arg2[%c184, %c0_14] : memref<208x4xf32, #tpu.memory_space<vmem>>, vector<1x4xf32>
    %c192 = arith.constant 192 : index
    %c0_15 = arith.constant 0 : index
    %23 = vector.load %arg2[%c192, %c0_15] : memref<208x4xf32, #tpu.memory_space<vmem>>, vector<4x4xf32>
    %c200 = arith.constant 200 : index
    %c0_16 = arith.constant 0 : index
    %24 = vector.load %arg2[%c200, %c0_16] : memref<208x4xf32, #tpu.memory_space<vmem>>, vector<1x4xf32>
    %cst_17 = arith.constant dense<0.000000e+00> : vector<2x4xf32>
    %25 = tpu.matmul %20, %21, %cst_17 {dimension_numbers = #tpu.dot_dimension_numbers<[1], [0], [0], [1], [0, 0, 1, 1], [], []>} : vector<2x4xf32>, vector<4x4xf32>, vector<2x4xf32> -> vector<2x4xf32>
    %26 = vector.broadcast %22 : vector<1x4xf32> to vector<2x4xf32>
    %27 = arith.addf %25, %26 : vector<2x4xf32>
    %cst_18 = arith.constant 0.000000e+00 : f32
    %28 = vector.broadcast %cst_18 : f32 to vector<2x4xf32>
    %29 = arith.maximumf %27, %28 : vector<2x4xf32>
    %cst_19 = arith.constant dense<0.000000e+00> : vector<2x4xf32>
    %30 = tpu.matmul %29, %23, %cst_19 {dimension_numbers = #tpu.dot_dimension_numbers<[1], [0], [0], [1], [0, 0, 1, 1], [], []>} : vector<2x4xf32>, vector<4x4xf32>, vector<2x4xf32> -> vector<2x4xf32>
    %31 = vector.broadcast %24 : vector<1x4xf32> to vector<2x4xf32>
    %32 = arith.addf %30, %31 : vector<2x4xf32>
    %c0_20 = arith.constant 0 : index
    %c0_21 = arith.constant 0 : index
    %33 = vector.load %arg4[%c0_20, %c0_21] : memref<2x4xf32, #tpu.memory_space<vmem>>, vector<2x4xf32>
    tpu.vector_store %arg4[%c0_20, %c0_21], %32 {strides = array<i32>} : memref<2x4xf32, #tpu.memory_space<vmem>>, vector<2x4xf32>,
    return
  }
}

</mosaic_0001>

<bundles_post_ra>
// kernel: gesa_forward.1
= control target key start
LH: loop header
LB: loop body
LE: loop exit
PB: predicated region body
PF: predicated region fallthrough
CT: control target
= control target key end

     0   :  { %vm34_vm0 = vcmask 64512   ;;  %v583_v3 = vmov 0.0   ;;  %v584_v7 = vmov 0.0|0.0   ;;  %s729_s0 = inlined_call_operand.vmem [shape: f32[8,8], index: 0, kind: input, shape index: {}]   ;;  %s730_s1 = inlined_call_operand.vmem [shape: f32[16,160], index: 1, kind: input, shape index: {}]   ;;  %s731_s2 = inlined_call_operand.vmem [shape: f32[208,4], index: 2, kind: input, shape index: {}]   ;;  %s732_s3 = inlined_call_operand.vmem [shape: f32[2,8], index: 3, kind: input, shape index: {}]   ;;  %s733_s4 = inlined_call_operand.hbm [shape: f32[2,4], index: 4, kind: output, shape index: {}]  }
   0x1   :  { %v20_v0 = vld [vmem:[%s730_s1 + $0x8] sm:$0xff]  ;;  %v19_v1 = vld [vmem:[%s730_s1] sm:$0xff]  ;;  %102 = vmatprep.mubr.f32.mxu0 %v583_v3  ;;  %v123_v6 = vld [vmem:[%s731_s2 + $0x10] sm:$0xff]  ;;  %517 = vmatprep.subr.bf16.mxu1 %v584_v7 }
   0x2   :  { %v18_v2 = vld [vmem:[%s729_s0] sm:$0xff]  ;;  %38 = vmatprep.subr.mxu0 %v20_v0  ;;  %v122_v5 = vld [vmem:[%s731_s2 + $0x8] sm:$0xff]  ;;  %v124_v9 = vld [vmem:[%s731_s2 + $0x18] sm:$0xff] }
   0x3   :  { %v121_v4 = vld [vmem:[%s731_s2] sm:$0xff]  ;;  %39 = vmatpush1.msra.mxu0 %v19_v1 }
   0x4   :  { %v518_v8 = vpack.c.bf16 %v122_v5, %v121_v4  ;;  %483 = vmatmul.mubr.msk.f32.vlgmr.msra.gmra.mrb[0].mxu0 %vm34_vm0, %v18_v2  ;;  %502 = vmatprep.subr.mxu0 %v583_v3 }
   0x5   :  { %9 = vsyncpa [#allocation3], 0  ;;  %v521_v10 = vpack.c.bf16 %v124_v9, %v123_v6  ;;  %v125_v11 = vld [vmem:[%s731_s2 + $0x20] sm:$0xff]  ;;  %v126_v12 = vld [vmem:[%s731_s2 + $0x28] sm:$0xff]  ;;  %v24_v35 = vlaneseq  ;;  %vm146_vm1 = vcmask 261120   ;;  %vm585_vm2 = vmmov 0  }
   0x6   :  { %519 = vmatpush1.bf16.msra.mxu1 %v518_v8  ;;  %v524_v13 = vpack.c.bf16 %v126_v12, %v125_v11  ;;  %v127_v14 = vld [vmem:[%s731_s2 + $0x30] sm:$0xff]  ;;  %v128_v15 = vld [vmem:[%s731_s2 + $0x38] sm:$0xff]  ;;  %v129_v17 = vld [vmem:[%s731_s2 + $0x40] sm:$0xff]  ;;  %504 = vmatprep.mubr.msk.f32.mxu0 %vm585_vm2, %v583_v3  ;;  %vm311_vm3 = vcmask 1043456   ;;  %vm307_vm4 = vcmask 31744   ;;  %s586_s21 = smov [#allocation2]  }
   0x7   :  { %520 = vmatprep.subr.bf16.mxu1 %v584_v7  ;;  %v527_v16 = vpack.c.bf16 %v128_v15, %v127_v14  ;;  %v130_v18 = vld [vmem:[%s731_s2 + $0x48] sm:$0xff]  ;;  %v131_v20 = vld [vmem:[%s731_s2 + $0x50] sm:$0xff]  ;;  %v132_v21 = vld [vmem:[%s731_s2 + $0x58] sm:$0xff]  ;;  %v25_v36 = vshrl.u32 %v24_v35, 7  ;;  %s474_s22 = sshll.u32 %s586_s21, 4  ;;  %vm466_vm5 = vcmask 25600   ;;  %s475_s22 = int_to_ptr.vmem [resolvable:$true] %s474_s22 }
   0x8   :  { %v530_v19 = vpack.c.bf16 %v130_v18, %v129_v17  ;;  %v533_v22 = vpack.c.bf16 %v132_v21, %v131_v20  ;;  %v133_v23 = vld [vmem:[%s731_s2 + $0x60] sm:$0xff]  ;;  %v134_v24 = vld [vmem:[%s731_s2 + $0x68] sm:$0xff]  ;;  %v135_v26 = vld [vmem:[%s731_s2 + $0x70] sm:$0xff]  ;;  %s559_s23 = scalar_lea.vmem %s475_s22, 32  ;;  %p564_p1 = scmp.lt.s32.totalorder %s475_s22, %s475_s22 }
   0x9   :  { %v536_v25 = vpack.c.bf16 %v134_v24, %v133_v23  ;;  %v136_v27 = vld [vmem:[%s731_s2 + $0x78] sm:$0xff]  ;;  %v137_v29 = vld [vmem:[%s731_s2 + $0x80] sm:$0xff]  ;;  %v138_v30 = vld [vmem:[%s731_s2 + $0x88] sm:$0xff]  ;;  %v26_v37 = vsub.s32 0, %v25_v36  ;;  %v30_v39 = vsub.s32 1, %v25_v36  ;;  %p560_p0 = scmp.ne.s32.totalorder %s475_s22, %s559_s23  ;;  %p565_p2 = scmp.lt.s32.totalorder %s559_s23, %s559_s23 }
   0xa   :  { %522 = vmatpush1.bf16.msra.mxu1 %v521_v10  ;;  %v539_v28 = vpack.c.bf16 %v136_v27, %v135_v26  ;;  %v542_v31 = vpack.c.bf16 %v138_v30, %v137_v29  ;;  %v139_v32 = vld [vmem:[%s731_s2 + $0x90] sm:$0xff]  ;;  %v140_v33 = vld [vmem:[%s731_s2 + $0x98] sm:$0xff]  ;;  %v486_v54 = vld [vmem:[%s731_s2 + $0xa0] ss:$0 sm:$0xff] }
   0xb   :  { %523 = vmatprep.subr.bf16.mxu1 %v584_v7  ;;  %v545_v34 = vpack.c.bf16 %v140_v33, %v139_v32  ;;  %v482_v38 = vld [vmem:[%s730_s1 + $0x10] ss:$8 sm:$0x3]  ;;  %v221_v58 = vld [vmem:[%s732_s3] sm:$0x3]  ;;  %p566_p3 = por %p565_p2, %p564_p1 }
   0xc   :  { %v27_v40 = vrot.slane %v482_v38, %v26_v37  ;;  %v31_v41 = vrot.slane %v482_v38, %v30_v39  ;;  %v299_v59 = vld [vmem:[%s731_s2 + $0xb0] sm:$0xf]  ;;  %v488_v60 = vld [vmem:[%s731_s2 + $0xa8] ss:$0 sm:$0xff]  ;;  %v301_v0 = vld [vmem:[%s731_s2 + $0xc0] sm:$0xf] }
   0xd   :  { %v490_v1 = vld [vmem:[%s731_s2 + $0xb8] ss:$0 sm:$0xff]  ;;  %p567_p4 = pnand %p566_p3, %p560_p0 }
   0xe   :  { %525 = vmatpush1.bf16.msra.mxu1 %v524_v13 }
   0xf   :  { %526 = vmatprep.subr.bf16.mxu1 %v584_v7 }
  0x12   :  { %528 = vmatpush1.bf16.msra.mxu1 %v527_v16 }
  0x13   :  { %529 = vmatprep.subr.bf16.mxu1 %v584_v7 }
  0x16   :  { %531 = vmatpush1.bf16.msra.mxu1 %v530_v19 }
  0x17   :  { %532 = vmatprep.subr.bf16.mxu1 %v584_v7 }
  0x1a   :  { %534 = vmatpush1.bf16.msra.mxu1 %v533_v22 }
  0x1b   :  { %535 = vmatprep.subr.bf16.mxu1 %v584_v7 }
  0x1e   :  { %537 = vmatpush1.bf16.msra.mxu1 %v536_v25 }
  0x1f   :  { %538 = vmatprep.subr.bf16.mxu1 %v584_v7 }
  0x22   :  { %540 = vmatpush1.bf16.msra.mxu1 %v539_v28 }
  0x23   :  { %541 = vmatprep.subr.bf16.mxu1 %v584_v7 }
  0x26   :  { %543 = vmatpush1.bf16.msra.mxu1 %v542_v31 }
  0x27   :  { %544 = vmatprep.subr.bf16.mxu1 %v584_v7  ;;  %v493_v7 = vld [vmem:[%s731_s2 + $0xc8] ss:$0 sm:$0xff] }
  0x2a   :  { %546 = vmatpush1.bf16.msra.mxu1 %v545_v34 }
  0xd7   :  { %v104_v42 = vpop.f32.mrb[0].mxu0 }
  0xd8   :  { %v105_v43 = vadd.f32 %v104_v42, %v27_v40  ;;  %v106_v44 = vpop.f32.mrb[1].mxu0 }
  0xd9   :  { %v107_v45 = vadd.f32 %v106_v44, %v31_v41 }
  0xda   :  { %v484_v46 = vmul.f32 -1.442695, %v105_v43 }
  0xdb   :  { %v485_v47 = vmul.f32 -1.442695, %v107_v45 }
  0xdc   :  { %551 = vpow2.f32 %v484_v46 }
  0xdd   :  { %553 = vpow2.f32 %v485_v47 }
  0xe6   :  { %v552_v48 = vpop.eup %551 }
  0xe7   :  { %v554_v49 = vpop.eup %553  ;;  %v115_v50 = vadd.f32 1.0, %v552_v48 }
  0xe8   :  { %v116_v51 = vadd.f32 1.0, %v554_v49 }
  0xea   :  { %555 = vrcp.f32 %v116_v51 }
  0xeb   :  { %557 = vrcp.f32 %v115_v50 }
  0xf4   :  { %v556_v52 = vpop.eup %555 }
  0xf5   :  { %v558_v53 = vpop.eup %557  ;;  %487 = vmatprep.mubr.msk.f32.mxu1 %vm146_vm1, %v556_v52 }
  0xf6   :  { %215 = vmatmul.mubr.f32.vlgmr.msra.gmra.mrb[0].mxu1 %v558_v53 }
 0x1c9   :  { %v216_v55 = vpop.f32.mrb[0].mxu1 }
 0x1ca   :  { %v217_v56 = vadd.f32 %v486_v54, %v216_v55  ;;  %v218_v57 = vpop.f32.mrb[1].mxu1 }
 0x1cc   :  { %503 = vmatpush3.msra.mxu0 %v217_v56 }
 0x1cd   :  { %505 = vmatmul.mubr.msk.f32.vlgmr.msra.gmra.mrb[2].mxu0 %vm34_vm0, %v221_v58  ;;  %507 = vmatprep.subr.mxu0 %v583_v3 }
 0x1ce   :  { %509 = vmatprep.mubr.msk.f32.mxu0 %vm585_vm2, %v583_v3  ;;  %508 = vmatpush3.msk.msra.mxu0 %vm311_vm3, %v299_v59 }
 0x1cf   :  { %512 = vmatprep.subr.mxu0 %v583_v3 }
 0x2a0   :  { %v295_v61 = vpop.f32.mrb[2].mxu0 }
 0x2a1   :  { %v296_v62 = vadd.f32 %v488_v60, %v295_v61  ;;  %v506_v63 = vpop.f32.mrb[3].mxu0 }
 0x2a3   :  { %510 = vmatmul.mubr.msk.f32.vlgmr.msra.gmra.mrb[4].mxu0 %vm307_vm4, %v296_v62 }
 0x2a4   :  { %514 = vmatprep.mubr.msk.f32.mxu0 %vm585_vm2, %v583_v3  ;;  %513 = vmatpush3.msk.msra.mxu0 %vm311_vm3, %v301_v0 }
 0x376   :  { %v381_v2 = vpop.f32.mrb[4].mxu0 }
 0x377   :  { %v382_v4 = vadd.f32 %v490_v1, %v381_v2  ;;  %v511_v5 = vpop.f32.mrb[5].mxu0 }
 0x379   :  { %v385_v6 = vmax.f32 %v382_v4, 0.0 }
 0x37b   :  { %515 = vmatmul.mubr.msk.f32.vlgmr.msra.gmra.mrb[6].mxu0 %vm307_vm4, %v385_v6 }
 0x44e   :  { %v462_v3 = vpop.f32.mrb[6].mxu0 }
 0x44f   :  { %v463_v8 = vadd.f32 %v493_v7, %v462_v3  ;;  %v516_v9 = vpop.f32.mrb[7].mxu0 }
 0x451   :  { %467 = vst.msk [vmem:[#allocation2] sm:$0x3] %vm466_vm5, %v463_v8 }
 0x452   :  { %570 = shalt.err (!%p567_p4)
}
 0x453   :  { %s571_s26 = scalar_lea.hbm %s733_s4, 32 }
 0x454   :  { %p572_p5 = scmp.ne.s32.totalorder %s733_s4, %s571_s26  ;;  %p575_p6 = scmp.lt.u32.totalorder %s571_s26, %s733_s4 }
 0x456   :  { %p577_p7 = pnand %p575_p6, %p572_p5 }
 0x458   :  { %580 = shalt.err (!%p577_p7)
}
 0x459   :  { %477 = dma.vmem_to_hbm [thread:$0]  %s475_s22, 32, %s733_s4, [#allocation3]  }
 0x45a   :  { %581 = dma.done.wait [#allocation3], 32  }
 0x45b   :  { %582 = vsyncadd [#allocation3], 4294967264 }
 0x45c   :  { %481 = vsyncpa [#allocation3], 1 }

</bundles_post_ra>
